<compile_context>
chip_gen: v7x
topology: tpu7x:2x2x1
jax: 0.10.0
libtpu: 0.0.40
codegen_flags: <defaults>
</compile_context>

<pallas_src>
import functools

import jax
import jax.numpy as jnp
from jax import lax
from jax.experimental import pallas as pl
from jax.experimental.pallas import tpu as pltpu


def _round_up(x, m):
    return (x + m - 1) // m * m


def _log_sigmoid(x):
    # Numerically stable log(sigmoid(x)) = -softplus(-x)
    return jnp.where(x >= 0, -jnp.log1p(jnp.exp(-x)), x - jnp.log1p(jnp.exp(x)))


def _vmem_limit_bytes(est_bytes):
    # >= the 32 MiB scoped default, <= 56 MiB so we stay clear of v7x's 64 MiB
    # physical VMEM; 1.25x the static working-set estimate in between.
    return int(min(56 * 2**20, max(32 * 2**20, int(1.25 * est_bytes))))


# --------------------------------------------------------------------------
# Pass 1: projection, sim tile, row stats, streamed column logsumexp.
# Grid: (B, ceil(M / tm)), dimension_semantics = ("parallel", "arbitrary").
# --------------------------------------------------------------------------
def _sim_stats_kernel(d0_ref, d1_ref, wf_ref, bf_ref, wm_row_ref,
                      sim_ref, rowstats_ref, colstats_ref,
                      md1_ref, z1s_ref, cmax_ref, csum_ref, *, m_total):
    i = pl.program_id(1)
    nt = pl.num_programs(1)
    tm = d0_ref.shape[1]
    d = d0_ref.shape[2]

    # Once per batch item: project desc1 through the plain (D, D) slice of the
    # fused weight (no wasted matchability columns), cache it in MXU dtype, and
    # compute the image-1 matchability log-sigmoids in (1, N) row layout.
    @pl.when(i == 0)
    def _():
        d1 = d1_ref[0]                                                     # (N, D)
        md1 = (jnp.dot(d1, wf_ref[:, 0:d], preferred_element_type=jnp.float32)
               + bf_ref[0:1, 0:d])
        md1_ref[...] = md1.astype(md1_ref.dtype)
        z1_row = lax.dot_general(                                          # (1, N)
            wm_row_ref[...], d1,
            dimension_numbers=(((1,), (1,)), ((), ())),
            preferred_element_type=jnp.float32) + bf_ref[0:1, d:d + 1]
        z1s_ref[...] = _log_sigmoid(z1_row)
        colstats_ref[0, 1:2, :] = _log_sigmoid(-z1_row).astype(colstats_ref.dtype)
        cmax_ref[...] = jnp.full(cmax_ref.shape, -jnp.inf, cmax_ref.dtype)
        csum_ref[...] = jnp.zeros(csum_ref.shape, csum_ref.dtype)

    # Fused projection for this M tile: md0 and the matchability logit z0 come
    # out of a single MXU pass (mxu_dtype x mxu_dtype -> f32 accumulation).
    d0 = d0_ref[0]                                                         # (TM, D)
    p0 = jnp.dot(d0, wf_ref[...], preferred_element_type=jnp.float32) + bf_ref[...]
    md0 = p0[:, 0:d]                                                       # (TM, D)
    z0 = p0[:, d:d + 1]                                                    # (TM, 1)

    # sim tile: contract the shared D axis directly (no md1.T materialization).
    sim = lax.dot_general(
        md0.astype(md1_ref.dtype), md1_ref[...],
        dimension_numbers=(((1,), (1,)), ((), ())),
        preferred_element_type=jnp.float32)                                # (TM, N)
    sim_ref[0] = sim.astype(sim_ref.dtype)

    # Mask padded / out-of-bounds rows only when the last tile is partial.
    if m_total % tm:
        row_ids = lax.broadcasted_iota(jnp.int32, (tm, 1), 0) + i * tm
        sim = jnp.where(row_ids < m_total, sim, -jnp.inf)

    # Single exp pass (global tile-max shift) feeds BOTH the row logsumexp and
    # the streamed column logsumexp partials.
    tmax = jnp.max(jnp.max(sim, axis=-1, keepdims=True), axis=0, keepdims=True)
    e = jnp.exp(sim - tmax)                                                # (TM, N)
    row_lse = tmax + jnp.log(jnp.sum(e, axis=-1, keepdims=True))           # (TM, 1)
    a_col = row_lse - _log_sigmoid(z0)                                     # (TM, 1)
    lsg_neg_z0 = _log_sigmoid(-z0)                                         # (TM, 1)
    cid = lax.broadcasted_iota(jnp.int32, (tm, 2), 1)
    rowstats_ref[0] = jnp.where(cid == 0, a_col, lsg_neg_z0).astype(rowstats_ref.dtype)

    col_sum = jnp.sum(e, axis=0, keepdims=True)                            # (1, N)
    old_max = cmax_ref[...]                                                # (1, 1)
    new_max = jnp.maximum(old_max, tmax)
    csum_ref[...] = (csum_ref[...] * jnp.exp(old_max - new_max)
                     + col_sum * jnp.exp(tmax - new_max))
    cmax_ref[...] = new_max

    # After the last M tile: finalize b_j = col_lse_j - log_sigmoid(z1_j).
    @pl.when(i == nt - 1)
    def _():
        col_lse = cmax_ref[...] + jnp.log(csum_ref[...])                   # (1, N)
        colstats_ref[0, 0:1, :] = (col_lse - z1s_ref[...]).astype(colstats_ref.dtype)


# --------------------------------------------------------------------------
# Pass 2: assemble the final (B, M+1, N+1) scores directly.
# Grid: (B, ceil((M+1) / tm2)), dimension_semantics = ("parallel", "parallel").
# --------------------------------------------------------------------------
def _assemble_kernel(sim_ref, rowstats_ref, colstats_ref, scores_ref, *, m_total):
    i = pl.program_id(1)
    tm = scores_ref.shape[1]
    n = sim_ref.shape[2]

    sim = sim_ref[0].astype(jnp.float32)           # (TM, N)
    a_col = rowstats_ref[0, :, 0:1]                # (TM, 1)
    lsg_neg_z0 = rowstats_ref[0, :, 1:2]           # (TM, 1)
    b_row = colstats_ref[0, 0:1, :]                # (1, N)

    # Core block of the assignment matrix plus the image-0 matchability column.
    scores_ref[0, :, 0:n] = (2.0 * sim - a_col - b_row).astype(scores_ref.dtype)
    scores_ref[0, :, n:n + 1] = lsg_neg_z0.astype(scores_ref.dtype)

    # Bottom matchability row (row M) lives in exactly one (the last) tile.
    im, lm = m_total // tm, m_total % tm

    @pl.when(i == im)
    def _():
        scores_ref[0, lm:lm + 1, 0:n] = colstats_ref[0, 1:2, :].astype(scores_ref.dtype)
        scores_ref[0, lm:lm + 1, n:n + 1] = jnp.zeros((1, 1), scores_ref.dtype)


# --------------------------------------------------------------------------
# Wrapper
# --------------------------------------------------------------------------
@functools.partial(jax.jit, static_argnames=("tm", "tm2", "sim_dtype", "mxu_dtype"))
def match_assignment(desc0, desc1, wp_t, bp, wm_t, bm, *, tm=None, tm2=None,
                     sim_dtype=None, mxu_dtype=jnp.bfloat16):
    """Pallas implementation of LightGlue MatchAssignment.forward.

    desc0: (B, M, D), desc1: (B, N, D)
    wp_t : (D, D)  final_proj.weight^T       bp: (1, D) final_proj.bias
    wm_t : (D, 1)  matchability.weight^T     bm: (1, 1) matchability.bias
    mxu_dtype: MXU operand dtype (bf16 default; accumulation stays f32).
    sim_dtype: storage dtype of the returned / re-read sim (bf16 when the MXU
               path is bf16, else the descriptor dtype).
    returns (scores (B, M+1, N+1), sim (B, M, N))
    """
    B, M, D = desc0.shape
    _, N, _ = desc1.shape
    out_dtype = desc0.dtype
    if sim_dtype is None:
        sim_dtype = jnp.bfloat16 if mxu_dtype == jnp.bfloat16 else out_dtype

    # ---- tiling ----------------------------------------------------------
    # tm=512 / tm2=1024 keep per-step working sets inside v7x's 64 MiB VMEM at
    # production sizes (M=N=2048, D=256) while sitting near the measured
    # mem-bound sweet spot on v5e/v6e (128 MiB VMEM).
    if tm is None:
        tm = 512
    tm = max(8, min(_round_up(tm, 8), _round_up(M, 8)))
    if tm2 is None:
        tm2 = 1024
    tm2 = max(8, min(_round_up(tm2, 8), _round_up(M + 1, 8)))
    nt1 = pl.cdiv(M, tm)
    nt2 = pl.cdiv(M + 1, tm2)
    df = D + 128                       # fused projection width (z0 at column D)

    # ---- parameter prep (scale folded into the projection weights) --------
    scale = float(D) ** -0.25
    wp32 = wp_t.astype(jnp.float32)
    wm32 = wm_t.astype(jnp.float32)
    wf = jnp.concatenate(
        [wp32 * scale, jnp.pad(wm32, ((0, 0), (0, 127)))], axis=1).astype(mxu_dtype)
    bf = jnp.concatenate(
        [bp.astype(jnp.float32).reshape(1, D) * scale,
         jnp.pad(bm.astype(jnp.float32).reshape(1, 1), ((0, 0), (0, 127)))], axis=1)
    wm_row = wm32.T.astype(mxu_dtype)                               # (1, D)
    d0_in = desc0.astype(mxu_dtype)
    d1_in = desc1.astype(mxu_dtype)

    # ---- VMEM budgets: double-buffered blocks + scratch + f32 temporaries --
    mb = jnp.dtype(mxu_dtype).itemsize
    sb = jnp.dtype(sim_dtype).itemsize
    ob = jnp.dtype(out_dtype).itemsize
    est1 = (2 * (tm * D + N * D + D * df + D) * mb + 2 * df * 4        # inputs
            + 2 * (tm * N * sb + tm * 2 * 4 + 2 * N * 4)               # outputs
            + (N * D * mb + 2 * N * 4 + 8)                             # scratch
            + (2 * tm * N + tm * df + 2 * N * D + 4 * N) * 4)          # f32 temps
    est2 = (2 * (tm2 * N * sb + tm2 * 2 * 4 + 2 * N * 4)
            + 2 * tm2 * (N + 1) * ob
            + 2 * tm2 * N * 4)

    # ---- pass 1: sim tiles + row/column statistics -------------------------
    # TODO(synk): with B=1 only one of v7x's two TensorCores is used here (the
    # M axis carries streamed column state); an N-tiled parallel axis with a
    # partial-combine epilogue would be needed for full single-pair v7x usage.
    sim_out, rowstats, colstats = pl.pallas_call(
        functools.partial(_sim_stats_kernel, m_total=M),
        out_shape=(
            jax.ShapeDtypeStruct((B, M, N), sim_dtype),
            jax.ShapeDtypeStruct((B, M, 2), jnp.float32),
            jax.ShapeDtypeStruct((B, 2, N), jnp.float32),
        ),
        grid=(B, nt1),
        in_specs=[
            pl.BlockSpec((1, tm, D), lambda b, i: (b, i, 0)),
            pl.BlockSpec((1, N, D), lambda b, i: (b, 0, 0)),
            pl.BlockSpec((D, df), lambda b, i: (0, 0)),
            pl.BlockSpec((1, df), lambda b, i: (0, 0)),
            pl.BlockSpec((1, D), lambda b, i: (0, 0)),
        ],
        out_specs=[
            pl.BlockSpec((1, tm, N), lambda b, i: (b, i, 0)),
            pl.BlockSpec((1, tm, 2), lambda b, i: (b, i, 0)),
            pl.BlockSpec((1, 2, N), lambda b, i: (b, 0, 0)),
        ],
        scratch_shapes=[
            pltpu.VMEM((N, D), mxu_dtype),        # cached projected desc1
            pltpu.VMEM((1, N), jnp.float32),      # log_sigmoid(z1)
            pltpu.VMEM((1, 1), jnp.float32),      # running global max
            pltpu.VMEM((1, N), jnp.float32),      # running column sum-exp
        ],
        compiler_params=pltpu.CompilerParams(
            dimension_semantics=("parallel", "arbitrary"),
            vmem_limit_bytes=_vmem_limit_bytes(est1)),
    )(d0_in, d1_in, wf, bf, wm_row)

    # ---- pass 2: write the final (B, M+1, N+1) scores directly -------------
    # Row tiles past the end of sim/rowstats are clamped to the last valid
    # block; those output rows are either the matchability row (overwritten in
    # the kernel) or beyond M+1 (dropped on writeback).
    last_blk = (M - 1) // tm2
    scores = pl.pallas_call(
        functools.partial(_assemble_kernel, m_total=M),
        out_shape=jax.ShapeDtypeStruct((B, M + 1, N + 1), out_dtype),
        grid=(B, nt2),
        in_specs=[
            pl.BlockSpec((1, tm2, N), lambda b, i: (b, jnp.minimum(i, last_blk), 0)),
            pl.BlockSpec((1, tm2, 2), lambda b, i: (b, jnp.minimum(i, last_blk), 0)),
            pl.BlockSpec((1, 2, N), lambda b, i: (b, 0, 0)),
        ],
        out_specs=pl.BlockSpec((1, tm2, N + 1), lambda b, i: (b, i, 0)),
        compiler_params=pltpu.CompilerParams(
            dimension_semantics=("parallel", "parallel"),
            vmem_limit_bytes=_vmem_limit_bytes(est2)),
    )(sim_out, rowstats, colstats)

    return scores, sim_out


# --------------------------------------------------------------------------
# Pure-JAX reference matching the PyTorch semantics.
# --------------------------------------------------------------------------
def _reference(desc0, desc1, wp_t, bp, wm_t, bm):
    D = desc0.shape[-1]
    md0 = desc0 @ wp_t + bp
    md1 = desc1 @ wp_t + bp
    md0 = md0 / D ** 0.25
    md1 = md1 / D ** 0.25
    sim = jnp.einsum('bmd,bnd->bmn', md0, md1)
    z0 = desc0 @ wm_t + bm
    z1 = desc1 @ wm_t + bm
    certainties = jax.nn.log_sigmoid(z0) + jnp.swapaxes(jax.nn.log_sigmoid(z1), 1, 2)
    scores0 = jax.nn.log_softmax(sim, axis=2)
    scores1 = jnp.swapaxes(jax.nn.log_softmax(jnp.swapaxes(sim, -1, -2), axis=2), -1, -2)
    b, m, n = sim.shape
    scores = jnp.zeros((b, m + 1, n + 1), sim.dtype)
    scores = scores.at[:, :m, :n].set(scores0 + scores1 + certainties)
    scores = scores.at[:, :-1, -1].set(jax.nn.log_sigmoid(-z0[..., 0]))
    scores = scores.at[:, -1, :-1].set(jax.nn.log_sigmoid(-z1[..., 0]))
    return scores, sim


if __name__ == "__main__":
    def make_inputs(B, M, N, D, seed=0):
        key = jax.random.PRNGKey(seed)
        ks = jax.random.split(key, 6)
        desc0 = jax.random.normal(ks[0], (B, M, D), jnp.float32)
        desc1 = jax.random.normal(ks[1], (B, N, D), jnp.float32)
        # nn.Linear shapes: weight (out, in), bias (out,)
        w_proj = jax.random.normal(ks[2], (D, D), jnp.float32) / jnp.sqrt(D)
        b_proj = jax.random.normal(ks[3], (D,), jnp.float32) * 0.1
        w_match = jax.random.normal(ks[4], (1, D), jnp.float32) / jnp.sqrt(D)
        b_match = jax.random.normal(ks[5], (1,), jnp.float32) * 0.1
        return (desc0, desc1, w_proj.T, b_proj.reshape(1, D),
                w_match.T, b_match.reshape(1, 1))

    # A: multi-tile, M % tm != 0 (exercises masking + clamped last tile), f32.
    args = make_inputs(2, 20, 16, 32)
    s, sm = match_assignment(*args, tm=8, tm2=8,
                             mxu_dtype=jnp.float32, sim_dtype=jnp.float32)
    jax.block_until_ready((s, sm))
    sr, smr = _reference(*args)
    assert s.shape == (2, 21, 17) and sm.shape == (2, 20, 16)
    assert jnp.allclose(sm, smr, atol=2e-4, rtol=2e-4)
    assert jnp.allclose(s, sr, atol=2e-4, rtol=2e-4)

    # B: M % tm == 0 (mask skipped; pass-2 gets an extra bottom-row tile), B=1.
    args = make_inputs(1, 24, 16, 32)
    s, sm = match_assignment(*args, tm=8, tm2=8,
                             mxu_dtype=jnp.float32, sim_dtype=jnp.float32)
    jax.block_until_ready((s, sm))
    sr, smr = _reference(*args)
    assert s.shape == (1, 25, 17) and sm.shape == (1, 24, 16)
    assert jnp.allclose(sm, smr, atol=2e-4, rtol=2e-4)
    assert jnp.allclose(s, sr, atol=2e-4, rtol=2e-4)

    # C: default fast path (bf16 MXU operands + bf16 sim), loose tolerance.
    args = make_inputs(2, 20, 16, 32)
    s, sm = match_assignment(*args)
    jax.block_until_ready((s, sm))
    sr, smr = _reference(*args)
    assert s.shape == (2, 21, 17) and sm.shape == (2, 20, 16)
    assert float(jnp.max(jnp.abs(sm.astype(jnp.float32) - smr))) < 0.2
    assert float(jnp.max(jnp.abs(s.astype(jnp.float32) - sr))) < 0.4

    print("KERNEL_OK")
</pallas_src>

<mosaic_0001>
module attributes {stable_mosaic.version = 11 : i64} {
  func.func @_sim_stats_kernel(%arg0: i32, %arg1: i32, %arg2: memref<1x8x32xf32, #tpu.memory_space<vmem>>, %arg3: memref<1x16x32xf32, #tpu.memory_space<vmem>>, %arg4: memref<32x160xf32, #tpu.memory_space<vmem>>, %arg5: memref<1x160xf32, #tpu.memory_space<vmem>>, %arg6: memref<1x32xf32, #tpu.memory_space<vmem>>, %arg7: memref<1x8x16xf32, #tpu.memory_space<vmem>>, %arg8: memref<1x8x2xf32, #tpu.memory_space<vmem>>, %arg9: memref<1x2x16xf32, #tpu.memory_space<vmem>>, %arg10: memref<16x32xf32, #tpu.memory_space<vmem>>, %arg11: memref<1x16xf32, #tpu.memory_space<vmem>>, %arg12: memref<1x1xf32, #tpu.memory_space<vmem>>, %arg13: memref<1x16xf32, #tpu.memory_space<vmem>>) attributes {dimension_semantics = [#tpu.dimension_semantics<parallel>, #tpu.dimension_semantics<arbitrary>], iteration_bounds = array<i64: 2, 3>, scalar_prefetch = 0 : i64, scratch_operands = 4 : i64, tpu.core_type = #tpu.core_type<tc>, window_params = [{transform_indices = @transform_0, window_bounds = array<i64: 1, 8, 32>}, {transform_indices = @transform_1, window_bounds = array<i64: 1, 16, 32>}, {pipeline_mode = #tpu.pipeline_mode<synchronous>, transform_indices = @transform_2, window_bounds = array<i64: 32, 160>}, {pipeline_mode = #tpu.pipeline_mode<synchronous>, transform_indices = @transform_3, window_bounds = array<i64: 1, 160>}, {pipeline_mode = #tpu.pipeline_mode<synchronous>, transform_indices = @transform_4, window_bounds = array<i64: 1, 32>}, {transform_indices = @transform_5, window_bounds = array<i64: 1, 8, 16>}, {transform_indices = @transform_6, window_bounds = array<i64: 1, 8, 2>}, {transform_indices = @transform_7, window_bounds = array<i64: 1, 2, 16>}]} {
    %c0_i32 = arith.constant 0 : i32
    %0 = arith.cmpi eq, %arg1, %c0_i32 : i32
    %1 = arith.extui %0 : i1 to i32
    %c0_i32_0 = arith.constant 0 : i32
    %2 = arith.cmpi ne, %1, %c0_i32_0 : i32
    scf.if %2 {
      %c0_38 = arith.constant 0 : index
      %c0_39 = arith.constant 0 : index
      %c0_40 = arith.constant 0 : index
      %96 = vector.load %arg3[%c0_38, %c0_39, %c0_40] : memref<1x16x32xf32, #tpu.memory_space<vmem>>, vector<1x16x32xf32>
      %97 = vector.shape_cast %96 : vector<1x16x32xf32> to vector<16x32xf32>
      %c0_41 = arith.constant 0 : index
      %c0_42 = arith.constant 0 : index
      %98 = vector.load %arg4[%c0_41, %c0_42] : memref<32x160xf32, #tpu.memory_space<vmem>>, vector<32x32xf32>
      %cst_43 = arith.constant dense<0.000000e+00> : vector<16x32xf32>
      %99 = tpu.matmul %97, %98, %cst_43 {dimension_numbers = #tpu.dot_dimension_numbers<[1], [0], [0], [1], [0, 0, 1, 1], [], []>} : vector<16x32xf32>, vector<32x32xf32>, vector<16x32xf32> -> vector<16x32xf32>
      %c0_44 = arith.constant 0 : index
      %c0_45 = arith.constant 0 : index
      %100 = vector.load %arg5[%c0_44, %c0_45] : memref<1x160xf32, #tpu.memory_space<vmem>>, vector<1x32xf32>
      %101 = vector.broadcast %100 : vector<1x32xf32> to vector<16x32xf32>
      %102 = arith.addf %99, %101 : vector<16x32xf32>
      %c0_46 = arith.constant 0 : index
      %c0_47 = arith.constant 0 : index
      %103 = vector.load %arg10[%c0_46, %c0_47] : memref<16x32xf32, #tpu.memory_space<vmem>>, vector<16x32xf32>
      tpu.vector_store %arg10[%c0_46, %c0_47], %102 {strides = array<i32>} : memref<16x32xf32, #tpu.memory_space<vmem>>, vector<16x32xf32>,
      %c0_48 = arith.constant 0 : index
      %c0_49 = arith.constant 0 : index
      %104 = vector.load %arg6[%c0_48, %c0_49] : memref<1x32xf32, #tpu.memory_space<vmem>>, vector<1x32xf32>
      %cst_50 = arith.constant dense<0.000000e+00> : vector<1x16xf32>
      %105 = tpu.matmul %104, %97, %cst_50 {dimension_numbers = #tpu.dot_dimension_numbers<[1], [1], [0], [0], [0, 0, 1, 0], [], []>} : vector<1x32xf32>, vector<16x32xf32>, vector<1x16xf32> -> vector<1x16xf32>
      %c0_51 = arith.constant 0 : index
      %c32 = arith.constant 32 : index
      %106 = vector.load %arg5[%c0_51, %c32] : memref<1x160xf32, #tpu.memory_space<vmem>>, vector<1x1xf32>
      %107 = vector.broadcast %106 : vector<1x1xf32> to vector<1x16xf32>
      %108 = arith.addf %105, %107 : vector<1x16xf32>
      %cst_52 = arith.constant 0.000000e+00 : f32
      %109 = vector.broadcast %cst_52 : f32 to vector<1x16xf32>
      %110 = arith.cmpf oge, %108, %109 : vector<1x16xf32>
      %cst_53 = arith.constant 0.000000e+00 : f32
      %111 = vector.broadcast %cst_53 : f32 to vector<1x16xf32>
      %112 = arith.subf %111, %108 : vector<1x16xf32>
      %113 = math.exp %112 : vector<1x16xf32>
      %114 = math.log1p %113 : vector<1x16xf32>
      %cst_54 = arith.constant 0.000000e+00 : f32
      %115 = vector.broadcast %cst_54 : f32 to vector<1x16xf32>
      %116 = arith.subf %115, %114 : vector<1x16xf32>
      %117 = math.exp %108 : vector<1x16xf32>
      %118 = math.log1p %117 : vector<1x16xf32>
      %119 = arith.subf %108, %118 : vector<1x16xf32>
      %120 = arith.select %110, %116, %119 : vector<1x16xi1>, vector<1x16xf32>
      %c0_55 = arith.constant 0 : index
      %c0_56 = arith.constant 0 : index
      %121 = vector.load %arg11[%c0_55, %c0_56] : memref<1x16xf32, #tpu.memory_space<vmem>>, vector<1x16xf32>
      tpu.vector_store %arg11[%c0_55, %c0_56], %120 {strides = array<i32>} : memref<1x16xf32, #tpu.memory_space<vmem>>, vector<1x16xf32>,
      %cst_57 = arith.constant 0.000000e+00 : f32
      %122 = vector.broadcast %cst_57 : f32 to vector<1x16xf32>
      %123 = arith.subf %122, %108 : vector<1x16xf32>
      %cst_58 = arith.constant 0.000000e+00 : f32
      %124 = vector.broadcast %cst_58 : f32 to vector<1x16xf32>
      %125 = arith.cmpf oge, %123, %124 : vector<1x16xf32>
      %cst_59 = arith.constant 0.000000e+00 : f32
      %126 = vector.broadcast %cst_59 : f32 to vector<1x16xf32>
      %127 = arith.subf %126, %123 : vector<1x16xf32>
      %128 = math.exp %127 : vector<1x16xf32>
      %129 = math.log1p %128 : vector<1x16xf32>
      %cst_60 = arith.constant 0.000000e+00 : f32
      %130 = vector.broadcast %cst_60 : f32 to vector<1x16xf32>
      %131 = arith.subf %130, %129 : vector<1x16xf32>
      %132 = math.exp %123 : vector<1x16xf32>
      %133 = math.log1p %132 : vector<1x16xf32>
      %134 = arith.subf %123, %133 : vector<1x16xf32>
      %135 = arith.select %125, %131, %134 : vector<1x16xi1>, vector<1x16xf32>
      %c0_61 = arith.constant 0 : index
      %c1 = arith.constant 1 : index
      %c0_62 = arith.constant 0 : index
      %136 = vector.load %arg9[%c0_61, %c1, %c0_62] : memref<1x2x16xf32, #tpu.memory_space<vmem>>, vector<1x1x16xf32>
      %137 = vector.shape_cast %136 : vector<1x1x16xf32> to vector<1x16xf32>
      %138 = vector.shape_cast %135 : vector<1x16xf32> to vector<1x1x16xf32>
      tpu.vector_store %arg9[%c0_61, %c1, %c0_62], %138 {strides = array<i32>} : memref<1x2x16xf32, #tpu.memory_space<vmem>>, vector<1x1x16xf32>,
      %cst_63 = arith.constant 0xFF800000 : f32
      %139 = vector.broadcast %cst_63 : f32 to vector<1x1xf32>
      %c0_64 = arith.constant 0 : index
      %c0_65 = arith.constant 0 : index
      %140 = vector.load %arg12[%c0_64, %c0_65] : memref<1x1xf32, #tpu.memory_space<vmem>>, vector<1x1xf32>
      tpu.vector_store %arg12[%c0_64, %c0_65], %139 {strides = array<i32>} : memref<1x1xf32, #tpu.memory_space<vmem>>, vector<1x1xf32>,
      %cst_66 = arith.constant 0.000000e+00 : f32
      %141 = vector.broadcast %cst_66 : f32 to vector<1x16xf32>
      %c0_67 = arith.constant 0 : index
      %c0_68 = arith.constant 0 : index
      %142 = vector.load %arg13[%c0_67, %c0_68] : memref<1x16xf32, #tpu.memory_space<vmem>>, vector<1x16xf32>
      tpu.vector_store %arg13[%c0_67, %c0_68], %141 {strides = array<i32>} : memref<1x16xf32, #tpu.memory_space<vmem>>, vector<1x16xf32>,
    } else {
    }
    %c0 = arith.constant 0 : index
    %c0_1 = arith.constant 0 : index
    %c0_2 = arith.constant 0 : index
    %3 = vector.load %arg2[%c0, %c0_1, %c0_2] : memref<1x8x32xf32, #tpu.memory_space<vmem>>, vector<1x8x32xf32>
    %4 = vector.shape_cast %3 : vector<1x8x32xf32> to vector<8x32xf32>
    %c0_3 = arith.constant 0 : index
    %c0_4 = arith.constant 0 : index
    %5 = vector.load %arg4[%c0_3, %c0_4] : memref<32x160xf32, #tpu.memory_space<vmem>>, vector<32x160xf32>
    %cst = arith.constant dense<0.000000e+00> : vector<8x160xf32>
    %6 = tpu.matmul %4, %5, %cst {dimension_numbers = #tpu.dot_dimension_numbers<[1], [0], [0], [1], [0, 0, 1, 1], [], []>} : vector<8x32xf32>, vector<32x160xf32>, vector<8x160xf32> -> vector<8x160xf32>
    %c0_5 = arith.constant 0 : index
    %c0_6 = arith.constant 0 : index
    %7 = vector.load %arg5[%c0_5, %c0_6] : memref<1x160xf32, #tpu.memory_space<vmem>>, vector<1x160xf32>
    %8 = vector.broadcast %7 : vector<1x160xf32> to vector<8x160xf32>
    %9 = arith.addf %6, %8 : vector<8x160xf32>
    %10 = vector.extract_strided_slice %9 {offsets = [0, 0], sizes = [8, 32], strides = [1, 1]} : vector<8x160xf32> to vector<8x32xf32>
    %11 = vector.extract_strided_slice %9 {offsets = [0, 32], sizes = [8, 1], strides = [1, 1]} : vector<8x160xf32> to vector<8x1xf32>
    %c0_7 = arith.constant 0 : index
    %c0_8 = arith.constant 0 : index
    %12 = vector.load %arg10[%c0_7, %c0_8] : memref<16x32xf32, #tpu.memory_space<vmem>>, vector<16x32xf32>
    %cst_9 = arith.constant dense<0.000000e+00> : vector<8x16xf32>
    %13 = tpu.matmul %10, %12, %cst_9 {dimension_numbers = #tpu.dot_dimension_numbers<[1], [1], [0], [0], [0, 0, 1, 0], [], []>} : vector<8x32xf32>, vector<16x32xf32>, vector<8x16xf32> -> vector<8x16xf32>
    %c0_10 = arith.constant 0 : index
    %c0_11 = arith.constant 0 : index
    %c0_12 = arith.constant 0 : index
    %14 = vector.load %arg7[%c0_10, %c0_11, %c0_12] : memref<1x8x16xf32, #tpu.memory_space<vmem>>, vector<1x8x16xf32>
    %15 = vector.shape_cast %14 : vector<1x8x16xf32> to vector<8x16xf32>
    %16 = vector.shape_cast %13 : vector<8x16xf32> to vector<1x8x16xf32>
    tpu.vector_store %arg7[%c0_10, %c0_11, %c0_12], %16 {strides = array<i32>} : memref<1x8x16xf32, #tpu.memory_space<vmem>>, vector<1x8x16xf32>,
    %17 = tpu.iota {dimensions = array<i32: 0>} : vector<8x1xi32>
    %c8_i32 = arith.constant 8 : i32
    %18 = arith.muli %arg1, %c8_i32 : i32
    %19 = vector.broadcast %18 : i32 to vector<8x1xi32>
    %20 = arith.addi %17, %19 : vector<8x1xi32>
    %c20_i32 = arith.constant 20 : i32
    %21 = vector.broadcast %c20_i32 : i32 to vector<8x1xi32>
    %22 = arith.cmpi slt, %20, %21 : vector<8x1xi32>
    %cst_13 = arith.constant 0xFF800000 : f32
    %23 = vector.shape_cast %22 : vector<8x1xi1> to vector<8x1xi1>
    %24 = vector.broadcast %23 : vector<8x1xi1> to vector<8x16xi1>
    %25 = vector.broadcast %cst_13 : f32 to vector<8x16xf32>
    %26 = arith.select %24, %13, %25 : vector<8x16xi1>, vector<8x16xf32>
    %cst_14 = arith.constant dense<0xFF800000> : vector<8xf32>
    %27 = vector.multi_reduction <maximumf>, %26, %cst_14 [1] : vector<8x16xf32> to vector<8xf32>
    %28 = vector.shape_cast %27 : vector<8xf32> to vector<8x1xf32>
    %cst_15 = arith.constant dense<0xFF800000> : vector<1xf32>
    %29 = vector.multi_reduction <maximumf>, %28, %cst_15 [0] : vector<8x1xf32> to vector<1xf32>
    %30 = vector.shape_cast %29 : vector<1xf32> to vector<1x1xf32>
    %31 = vector.broadcast %30 : vector<1x1xf32> to vector<8x16xf32>
    %32 = arith.subf %26, %31 : vector<8x16xf32>
    %33 = math.exp %32 : vector<8x16xf32>
    %cst_16 = arith.constant dense<0.000000e+00> : vector<8xf32>
    %34 = vector.multi_reduction <add>, %33, %cst_16 [1] : vector<8x16xf32> to vector<8xf32>
    %35 = vector.shape_cast %34 : vector<8xf32> to vector<8x1xf32>
    %36 = math.log %35 : vector<8x1xf32>
    %37 = vector.broadcast %30 : vector<1x1xf32> to vector<8x1xf32>
    %38 = arith.addf %37, %36 : vector<8x1xf32>
    %cst_17 = arith.constant 0.000000e+00 : f32
    %39 = vector.broadcast %cst_17 : f32 to vector<8x1xf32>
    %40 = arith.cmpf oge, %11, %39 : vector<8x1xf32>
    %cst_18 = arith.constant 0.000000e+00 : f32
    %41 = vector.broadcast %cst_18 : f32 to vector<8x1xf32>
    %42 = arith.subf %41, %11 : vector<8x1xf32>
    %43 = math.exp %42 : vector<8x1xf32>
    %44 = math.log1p %43 : vector<8x1xf32>
    %cst_19 = arith.constant 0.000000e+00 : f32
    %45 = vector.broadcast %cst_19 : f32 to vector<8x1xf32>
    %46 = arith.subf %45, %44 : vector<8x1xf32>
    %47 = math.exp %11 : vector<8x1xf32>
    %48 = math.log1p %47 : vector<8x1xf32>
    %49 = arith.subf %11, %48 : vector<8x1xf32>
    %50 = arith.select %40, %46, %49 : vector<8x1xi1>, vector<8x1xf32>
    %51 = arith.subf %38, %50 : vector<8x1xf32>
    %cst_20 = arith.constant 0.000000e+00 : f32
    %52 = vector.broadcast %cst_20 : f32 to vector<8x1xf32>
    %53 = arith.subf %52, %11 : vector<8x1xf32>
    %cst_21 = arith.constant 0.000000e+00 : f32
    %54 = vector.broadcast %cst_21 : f32 to vector<8x1xf32>
    %55 = arith.cmpf oge, %53, %54 : vector<8x1xf32>
    %cst_22 = arith.constant 0.000000e+00 : f32
    %56 = vector.broadcast %cst_22 : f32 to vector<8x1xf32>
    %57 = arith.subf %56, %53 : vector<8x1xf32>
    %58 = math.exp %57 : vector<8x1xf32>
    %59 = math.log1p %58 : vector<8x1xf32>
    %cst_23 = arith.constant 0.000000e+00 : f32
    %60 = vector.broadcast %cst_23 : f32 to vector<8x1xf32>
    %61 = arith.subf %60, %59 : vector<8x1xf32>
    %62 = math.exp %53 : vector<8x1xf32>
    %63 = math.log1p %62 : vector<8x1xf32>
    %64 = arith.subf %53, %63 : vector<8x1xf32>
    %65 = arith.select %55, %61, %64 : vector<8x1xi1>, vector<8x1xf32>
    %66 = tpu.iota {dimensions = array<i32: 1>} : vector<8x2xi32>
    %c0_i32_24 = arith.constant 0 : i32
    %67 = vector.broadcast %c0_i32_24 : i32 to vector<8x2xi32>
    %68 = arith.cmpi eq, %66, %67 : vector<8x2xi32>
    %69 = vector.shape_cast %51 : vector<8x1xf32> to vector<8x1xf32>
    %70 = vector.broadcast %69 : vector<8x1xf32> to vector<8x2xf32>
    %71 = vector.shape_cast %65 : vector<8x1xf32> to vector<8x1xf32>
    %72 = vector.broadcast %71 : vector<8x1xf32> to vector<8x2xf32>
    %73 = arith.select %68, %70, %72 : vector<8x2xi1>, vector<8x2xf32>
    %c0_25 = arith.constant 0 : index
    %c0_26 = arith.constant 0 : index
    %c0_27 = arith.constant 0 : index
    %74 = vector.load %arg8[%c0_25, %c0_26, %c0_27] : memref<1x8x2xf32, #tpu.memory_space<vmem>>, vector<1x8x2xf32>
    %75 = vector.shape_cast %74 : vector<1x8x2xf32> to vector<8x2xf32>
    %76 = vector.shape_cast %73 : vector<8x2xf32> to vector<1x8x2xf32>
    tpu.vector_store %arg8[%c0_25, %c0_26, %c0_27], %76 {strides = array<i32>} : memref<1x8x2xf32, #tpu.memory_space<vmem>>, vector<1x8x2xf32>,
    %cst_28 = arith.constant dense<0.000000e+00> : vector<16xf32>
    %77 = vector.multi_reduction <add>, %33, %cst_28 [0] : vector<8x16xf32> to vector<16xf32>
    %78 = vector.shape_cast %77 : vector<16xf32> to vector<1x16xf32>
    %c0_29 = arith.constant 0 : index
    %c0_30 = arith.constant 0 : index
    %79 = vector.load %arg12[%c0_29, %c0_30] : memref<1x1xf32, #tpu.memory_space<vmem>>, vector<1x1xf32>
    %80 = arith.maximumf %79, %30 : vector<1x1xf32>
    %c0_31 = arith.constant 0 : index
    %c0_32 = arith.constant 0 : index
    %81 = vector.load %arg13[%c0_31, %c0_32] : memref<1x16xf32, #tpu.memory_space<vmem>>, vector<1x16xf32>
    %82 = arith.subf %79, %80 : vector<1x1xf32>
    %83 = math.exp %82 : vector<1x1xf32>
    %84 = vector.broadcast %83 : vector<1x1xf32> to vector<1x16xf32>
    %85 = arith.mulf %81, %84 : vector<1x16xf32>
    %86 = arith.subf %30, %80 : vector<1x1xf32>
    %87 = math.exp %86 : vector<1x1xf32>
    %88 = vector.broadcast %87 : vector<1x1xf32> to vector<1x16xf32>
    %89 = arith.mulf %78, %88 : vector<1x16xf32>
    %90 = arith.addf %85, %89 : vector<1x16xf32>
    %c0_33 = arith.constant 0 : index
    %c0_34 = arith.constant 0 : index
    %91 = vector.load %arg13[%c0_33, %c0_34] : memref<1x16xf32, #tpu.memory_space<vmem>>, vector<1x16xf32>
    tpu.vector_store %arg13[%c0_33, %c0_34], %90 {strides = array<i32>} : memref<1x16xf32, #tpu.memory_space<vmem>>, vector<1x16xf32>,
    %c0_35 = arith.constant 0 : index
    %c0_36 = arith.constant 0 : index
    %92 = vector.load %arg12[%c0_35, %c0_36] : memref<1x1xf32, #tpu.memory_space<vmem>>, vector<1x1xf32>
    tpu.vector_store %arg12[%c0_35, %c0_36], %80 {strides = array<i32>} : memref<1x1xf32, #tpu.memory_space<vmem>>, vector<1x1xf32>,
    %c2_i32 = arith.constant 2 : i32
    %93 = arith.cmpi eq, %arg1, %c2_i32 : i32
    %94 = arith.extui %93 : i1 to i32
    %c0_i32_37 = arith.constant 0 : i32
    %95 = arith.cmpi ne, %94, %c0_i32_37 : i32
    scf.if %95 {
      %c0_38 = arith.constant 0 : index
      %c0_39 = arith.constant 0 : index
      %96 = vector.load %arg12[%c0_38, %c0_39] : memref<1x1xf32, #tpu.memory_space<vmem>>, vector<1x1xf32>
      %c0_40 = arith.constant 0 : index
      %c0_41 = arith.constant 0 : index
      %97 = vector.load %arg13[%c0_40, %c0_41] : memref<1x16xf32, #tpu.memory_space<vmem>>, vector<1x16xf32>
      %98 = math.log %97 : vector<1x16xf32>
      %99 = vector.broadcast %96 : vector<1x1xf32> to vector<1x16xf32>
      %100 = arith.addf %99, %98 : vector<1x16xf32>
      %c0_42 = arith.constant 0 : index
      %c0_43 = arith.constant 0 : index
      %101 = vector.load %arg11[%c0_42, %c0_43] : memref<1x16xf32, #tpu.memory_space<vmem>>, vector<1x16xf32>
      %102 = arith.subf %100, %101 : vector<1x16xf32>
      %c0_44 = arith.constant 0 : index
      %c0_45 = arith.constant 0 : index
      %c0_46 = arith.constant 0 : index
      %103 = vector.load %arg9[%c0_44, %c0_45, %c0_46] : memref<1x2x16xf32, #tpu.memory_space<vmem>>, vector<1x1x16xf32>
      %104 = vector.shape_cast %103 : vector<1x1x16xf32> to vector<1x16xf32>
      %105 = vector.shape_cast %102 : vector<1x16xf32> to vector<1x1x16xf32>
      tpu.vector_store %arg9[%c0_44, %c0_45, %c0_46], %105 {strides = array<i32>} : memref<1x2x16xf32, #tpu.memory_space<vmem>>, vector<1x1x16xf32>,
    } else {
    }
    return
  }
  func.func @transform_0(%arg0: i32, %arg1: i32) -> (i32, i32, i32) {
    %c0_i32 = arith.constant 0 : i32
    %c0_i32_0 = arith.constant 0 : i32
    return %arg0, %arg1, %c0_i32 : i32, i32, i32
  }
  func.func @transform_1(%arg0: i32, %arg1: i32) -> (i32, i32, i32) {
    %c0_i32 = arith.constant 0 : i32
    %c0_i32_0 = arith.constant 0 : i32
    %c0_i32_1 = arith.constant 0 : i32
    return %arg0, %c0_i32, %c0_i32_0 : i32, i32, i32
  }
  func.func @transform_2(%arg0: i32, %arg1: i32) -> (i32, i32) {
    %c0_i32 = arith.constant 0 : i32
    %c0_i32_0 = arith.constant 0 : i32
    %c0_i32_1 = arith.constant 0 : i32
    return %c0_i32, %c0_i32_0 : i32, i32
  }
  func.func @transform_3(%arg0: i32, %arg1: i32) -> (i32, i32) {
    %c0_i32 = arith.constant 0 : i32
    %c0_i32_0 = arith.constant 0 : i32
    %c0_i32_1 = arith.constant 0 : i32
    return %c0_i32, %c0_i32_0 : i32, i32
  }
  func.func @transform_4(%arg0: i32, %arg1: i32) -> (i32, i32) {
    %c0_i32 = arith.constant 0 : i32
    %c0_i32_0 = arith.constant 0 : i32
    %c0_i32_1 = arith.constant 0 : i32
    return %c0_i32, %c0_i32_0 : i32, i32
  }
  func.func @transform_5(%arg0: i32, %arg1: i32) -> (i32, i32, i32) {
    %c0_i32 = arith.constant 0 : i32
    %c0_i32_0 = arith.constant 0 : i32
    return %arg0, %arg1, %c0_i32 : i32, i32, i32
  }
  func.func @transform_6(%arg0: i32, %arg1: i32) -> (i32, i32, i32) {
    %c0_i32 = arith.constant 0 : i32
    %c0_i32_0 = arith.constant 0 : i32
    return %arg0, %arg1, %c0_i32 : i32, i32, i32
  }
  func.func @transform_7(%arg0: i32, %arg1: i32) -> (i32, i32, i32) {
    %c0_i32 = arith.constant 0 : i32
    %c0_i32_0 = arith.constant 0 : i32
    %c0_i32_1 = arith.constant 0 : i32
    return %arg0, %c0_i32, %c0_i32_0 : i32, i32, i32
  }
}

module attributes {stable_mosaic.version = 11 : i64} {
  func.func @_assemble_kernel(%arg0: i32, %arg1: i32, %arg2: memref<1x8x16xf32, #tpu.memory_space<vmem>>, %arg3: memref<1x8x2xf32, #tpu.memory_space<vmem>>, %arg4: memref<1x2x16xf32, #tpu.memory_space<vmem>>, %arg5: memref<1x8x17xf32, #tpu.memory_space<vmem>>) attributes {dimension_semantics = [#tpu.dimension_semantics<parallel>, #tpu.dimension_semantics<parallel>], iteration_bounds = array<i64: 2, 3>, scalar_prefetch = 0 : i64, scratch_operands = 0 : i64, tpu.core_type = #tpu.core_type<tc>, window_params = [{transform_indices = @transform_0, window_bounds = array<i64: 1, 8, 16>}, {transform_indices = @transform_1, window_bounds = array<i64: 1, 8, 2>}, {transform_indices = @transform_2, window_bounds = array<i64: 1, 2, 16>}, {transform_indices = @transform_3, window_bounds = array<i64: 1, 8, 17>}]} {
    %c0 = arith.constant 0 : index
    %c0_0 = arith.constant 0 : index
    %c0_1 = arith.constant 0 : index
    %0 = vector.load %arg2[%c0, %c0_0, %c0_1] : memref<1x8x16xf32, #tpu.memory_space<vmem>>, vector<1x8x16xf32>
    %1 = vector.shape_cast %0 : vector<1x8x16xf32> to vector<8x16xf32>
    %c0_2 = arith.constant 0 : index
    %c0_3 = arith.constant 0 : index
    %c0_4 = arith.constant 0 : index
    %2 = vector.load %arg3[%c0_2, %c0_3, %c0_4] : memref<1x8x2xf32, #tpu.memory_space<vmem>>, vector<1x8x1xf32>
    %3 = vector.shape_cast %2 : vector<1x8x1xf32> to vector<8x1xf32>
    %c0_5 = arith.constant 0 : index
    %c0_6 = arith.constant 0 : index
    %c1 = arith.constant 1 : index
    %4 = vector.load %arg3[%c0_5, %c0_6, %c1] : memref<1x8x2xf32, #tpu.memory_space<vmem>>, vector<1x8x1xf32>
    %5 = vector.shape_cast %4 : vector<1x8x1xf32> to vector<8x1xf32>
    %c0_7 = arith.constant 0 : index
    %c0_8 = arith.constant 0 : index
    %c0_9 = arith.constant 0 : index
    %6 = vector.load %arg4[%c0_7, %c0_8, %c0_9] : memref<1x2x16xf32, #tpu.memory_space<vmem>>, vector<1x1x16xf32>
    %7 = vector.shape_cast %6 : vector<1x1x16xf32> to vector<1x16xf32>
    %cst = arith.constant 2.000000e+00 : f32
    %8 = vector.broadcast %cst : f32 to vector<8x16xf32>
    %9 = arith.mulf %8, %1 : vector<8x16xf32>
    %10 = vector.broadcast %3 : vector<8x1xf32> to vector<8x16xf32>
    %11 = arith.subf %9, %10 : vector<8x16xf32>
    %12 = vector.broadcast %7 : vector<1x16xf32> to vector<8x16xf32>
    %13 = arith.subf %11, %12 : vector<8x16xf32>
    %c0_10 = arith.constant 0 : index
    %c0_11 = arith.constant 0 : index
    %c0_12 = arith.constant 0 : index
    %14 = vector.load %arg5[%c0_10, %c0_11, %c0_12] : memref<1x8x17xf32, #tpu.memory_space<vmem>>, vector<1x8x16xf32>
    %15 = vector.shape_cast %14 : vector<1x8x16xf32> to vector<8x16xf32>
    %16 = vector.shape_cast %13 : vector<8x16xf32> to vector<1x8x16xf32>
    tpu.vector_store %arg5[%c0_10, %c0_11, %c0_12], %16 {strides = array<i32>} : memref<1x8x17xf32, #tpu.memory_space<vmem>>, vector<1x8x16xf32>,
    %c0_13 = arith.constant 0 : index
    %c0_14 = arith.constant 0 : index
    %c16 = arith.constant 16 : index
    %17 = vector.load %arg5[%c0_13, %c0_14, %c16] : memref<1x8x17xf32, #tpu.memory_space<vmem>>, vector<1x8x1xf32>
    %18 = vector.shape_cast %17 : vector<1x8x1xf32> to vector<8x1xf32>
    %19 = vector.shape_cast %5 : vector<8x1xf32> to vector<1x8x1xf32>
    tpu.vector_store %arg5[%c0_13, %c0_14, %c16], %19 {strides = array<i32>} : memref<1x8x17xf32, #tpu.memory_space<vmem>>, vector<1x8x1xf32>,
    %c2_i32 = arith.constant 2 : i32
    %20 = arith.cmpi eq, %arg1, %c2_i32 : i32
    %21 = arith.extui %20 : i1 to i32
    %c0_i32 = arith.constant 0 : i32
    %22 = arith.cmpi ne, %21, %c0_i32 : i32
    scf.if %22 {
      %c0_15 = arith.constant 0 : index
      %c1_16 = arith.constant 1 : index
      %c0_17 = arith.constant 0 : index
      %23 = vector.load %arg4[%c0_15, %c1_16, %c0_17] : memref<1x2x16xf32, #tpu.memory_space<vmem>>, vector<1x1x16xf32>
      %24 = vector.shape_cast %23 : vector<1x1x16xf32> to vector<1x16xf32>
      %c0_18 = arith.constant 0 : index
      %c4 = arith.constant 4 : index
      %c0_19 = arith.constant 0 : index
      %25 = vector.load %arg5[%c0_18, %c4, %c0_19] : memref<1x8x17xf32, #tpu.memory_space<vmem>>, vector<1x1x16xf32>
      %26 = vector.shape_cast %25 : vector<1x1x16xf32> to vector<1x16xf32>
      %27 = vector.shape_cast %24 : vector<1x16xf32> to vector<1x1x16xf32>
      tpu.vector_store %arg5[%c0_18, %c4, %c0_19], %27 {strides = array<i32>} : memref<1x8x17xf32, #tpu.memory_space<vmem>>, vector<1x1x16xf32>,
      %cst_20 = arith.constant 0.000000e+00 : f32
      %28 = vector.broadcast %cst_20 : f32 to vector<1x1xf32>
      %c0_21 = arith.constant 0 : index
      %c4_22 = arith.constant 4 : index
      %c16_23 = arith.constant 16 : index
      %29 = vector.load %arg5[%c0_21, %c4_22, %c16_23] : memref<1x8x17xf32, #tpu.memory_space<vmem>>, vector<1x1x1xf32>
      %30 = vector.shape_cast %29 : vector<1x1x1xf32> to vector<1x1xf32>
      %31 = vector.shape_cast %28 : vector<1x1xf32> to vector<1x1x1xf32>
      tpu.vector_store %arg5[%c0_21, %c4_22, %c16_23], %31 {strides = array<i32>} : memref<1x8x17xf32, #tpu.memory_space<vmem>>, vector<1x1x1xf32>,
    } else {
    }
    return
  }
  func.func @transform_0(%arg0: i32, %arg1: i32) -> (i32, i32, i32) {
    %c2_i32 = arith.constant 2 : i32
    %0 = arith.minsi %arg1, %c2_i32 : i32
    %c0_i32 = arith.constant 0 : i32
    %c0_i32_0 = arith.constant 0 : i32
    return %arg0, %0, %c0_i32 : i32, i32, i32
  }
  func.func @transform_1(%arg0: i32, %arg1: i32) -> (i32, i32, i32) {
    %c2_i32 = arith.constant 2 : i32
    %0 = arith.minsi %arg1, %c2_i32 : i32
    %c0_i32 = arith.constant 0 : i32
    %c0_i32_0 = arith.constant 0 : i32
    return %arg0, %0, %c0_i32 : i32, i32, i32
  }
  func.func @transform_2(%arg0: i32, %arg1: i32) -> (i32, i32, i32) {
    %c0_i32 = arith.constant 0 : i32
    %c0_i32_0 = arith.constant 0 : i32
    %c0_i32_1 = arith.constant 0 : i32
    return %arg0, %c0_i32, %c0_i32_0 : i32, i32, i32
  }
  func.func @transform_3(%arg0: i32, %arg1: i32) -> (i32, i32, i32) {
    %c0_i32 = arith.constant 0 : i32
    %c0_i32_0 = arith.constant 0 : i32
    return %arg0, %arg1, %c0_i32 : i32, i32, i32
  }
}

</mosaic_0001>

<bundles_post_ra>
// kernel: match_assignment.3
= control target key start
LH: loop header
LB: loop body
LE: loop exit
PB: predicated region body
PF: predicated region fallthrough
CT: control target
= control target key end

     0   :  { %s552_s12 = smov 0   ;;  %s554_s13 = smov 0   ;;  %s614_s0 = inlined_call_operand.vmem [shape: f32[2,20,16], index: 0, kind: input, shape index: {}]   ;;  %s615_s1 = inlined_call_operand.vmem [shape: f32[2,20,2], index: 1, kind: input, shape index: {}]   ;;  %s616_s2 = inlined_call_operand.vmem [shape: f32[2,2,16], index: 2, kind: input, shape index: {}]   ;;  %s617_s3 = inlined_call_operand.vmem [shape: f32[2,21,17], index: 3, kind: output, shape index: {}]  }
   0x1   :  { %s556_s14 = smov 0   ;;  %s558_s15 = smov 0  }
   0x2   :  { %s560_s16 = smov 0  }
   0x3 LB: > { %s22_s17 = sadd.s32 1, %s519_s14  ;;  %s25_s18 = sadd.s32 1, %s523_s15  ;;  %s527_s16 = sphi %s560_s16, %s13_s16   ;;  %s523_s15 = sphi %s558_s15, %s621_s15   ;;  %s519_s14 = sphi %s556_s14, %s620_s14   ;;  %s515_s13 = sphi %s554_s13, %s619_s13   ;;  %s511_s12 = sphi %s552_s12, %s618_s12  }
   0x4   : > { %p23_p0 = scmp.ge.s32.totalorder %s22_s17, 3  ;;  %p429_p1 = scmp.ge.s32.totalorder %s527_s16, 1 }
   0x5   : > { %p196_p2 = scmp.lt.s32.totalorder %s527_s16, 7 }
   0x6   : > { %s623_s17 = smov (%p23_p0, %s22_s17), 0  ;;  %s625_s18 = smov (!%p23_p0, %s25_s18), %s523_s15 }
   0x7   : > { %p197_p3 = pnand %p429_p1, %p196_p2  ;;  %p27_p4 = scmp.ge.s32.totalorder %s625_s18, 2 }
   0x8   : > { %p242_p5 = scmp.lt.s32.totalorder (!%p197_p3), %s511_s12, 2  ;;  %p244_p6 = scmp.lt.s32.totalorder (!%p197_p3), %s515_s13, 1  ;;  %v529_v0 = vmov (!%p197_p3), 0   ;;  %vm293_vm0 = vcmask (!%p197_p3), 130048   ;;  %vm298_vm1 = vcmask (!%p197_p3), 138368  }
   0x9   : > { %s627_s18 = smov (%p27_p4, %s625_s18), 0  ;;  %200 = sbr.rel (%p197_p3) target bundleno = 161 (0xa1), region = 32 }
   0xa   : > { %488 = vset.pattern.permute.xlu0 (!%p197_p3), %v529_v0  ;;  %s530_s28 = smov (!%p197_p3), 15   ;;  %p441_p7 = scmp.ne.s32.totalorder (!%p197_p3), %s511_s12, 2 }
  0x10   : > { %s243_s19 = scalar_select %p242_p5, %s511_s12, 2 }
  0x11   : > { %s629_s13 = smov (!%p244_p6, %s515_s13), 1  ;;  %vm305_vm2 = vcmask (!%p441_p7), 122880   ;;  %vm307_vm3 = vcmask (!%p441_p7), 131200   ;;  %v531_v10 = vmov (!%p441_p7), 0.0  }
  0x12   : > { %s247_s20 = scalar_select %p242_p5, %s243_s19, 2 }
  0x13   : > { %s444_s21 = smul.u32 3, %s629_s13  ;;  %s438_s5 = sshll.u32 %s629_s13, 1 }
  0x14   : > { %s269_s8 = scalar_lea.vmem %s616_s2, %s438_s5 }
  0x15   : > { %s249_s22 = sadd.s32 %s444_s21, %s247_s20  ;;  %s275_s23 = sadd.s32 %s444_s21, %s243_s19  ;;  %v440_v4 = vld [vmem:[%s269_s8] ss:$0 sm:$0xff]  ;;  %v304_v9 = vld [vmem:[%s269_s8 + $0x1] sm:$0x1] (!%p441_p7) }
  0x16   : > { %s433_s24 = sshll.u32 %s249_s22, 3  ;;  %s439_s9 = sshll.u32 %s275_s23, 3 }
  0x17   : > { %s263_s27 = scalar_lea.vmem %s615_s1, %s433_s24  ;;  %s251_s4 = scalar_lea.vmem %s614_s0, %s433_s24 }
  0x18   : > { %v279_v1 = vld [vmem:[%s263_s27] sm:$0xff]  ;;  %s277_s19 = scalar_lea.vmem %s617_s3, %s439_s9 }
  0x19   : > { %284 = vperm.xlu0 %488, %v279_v1   ;;  %v278_v2 = vld [vmem:[%s251_s4] sm:$0xff] }
  0x1a   : > { %v281_v3 = vmul.f32 2.0, %v278_v2 }
  0x1d   : > { %295 = vrot.lane.b32.xlu0 %v279_v1, %s530_s28 }
  0x98   : > { %v285_v5 = vpop.permute.xlu0 %284  ;;  %303 = sbr.rel (%p441_p7) target bundleno = 161 (0xa1), region = 36 }
  0x99   : > { %v287_v6 = vsub.f32 %v281_v3, %v285_v5 }
  0x9b   : > { %v292_v7 = vsub.f32 %v287_v6, %v440_v4 }
  0x9c   : > { %v296_v8 = vpop.permute.xlu0 %295 }
  0x9d   : > { %294 = vst.msk [vmem:[%s277_s19] sm:$0xff] %vm293_vm0, %v292_v7 }
  0x9e   : > { %299 = vst.msk [vmem:[%s277_s19] sm:$0xff] %vm298_vm1, %v296_v8 }
  0x9f   : > { %306 = vst.msk [vmem:[%s277_s19 + $0x4] sm:$0x1] %vm305_vm2, %v304_v9 }
  0xa0   : > { %308 = vst.msk [vmem:[%s277_s19 + $0x4] sm:$0x1] %vm307_vm3, %v531_v10 }
  0xa1 PF: > { %s13_s16 = sadd.s32 1, %s527_s16   ;;  %s618_s12 = smov %s519_s14 }
  0xa2   : > { %p10_p8 = scmp.ge.s32.totalorder %s13_s16, 8   ;;  %s619_s13 = smov %s523_s15 }
  0xa3   : > { %s620_s14 = smov %s623_s17  ;;  %s621_s15 = smov %s627_s18 }
  0xa4   :  { %12 = sbr.rel (!%p10_p8) target bundleno = 3 (0x3), region = 72 }

// kernel: match_assignment.2
= control target key start
LH: loop header
LB: loop body
LE: loop exit
PB: predicated region body
PF: predicated region fallthrough
CT: control target
= control target key end

     0   :  { %s1363_s24 = smov 0   ;;  %s1365_s25 = smov 0   ;;  %s1544_s0 = inlined_call_operand.vmem [shape: f32[2,20,32], index: 0, kind: input, shape index: {}]   ;;  %s1545_s1 = inlined_call_operand.vmem [shape: f32[2,16,32], index: 1, kind: input, shape index: {}]   ;;  %s1546_s2 = inlined_call_operand.vmem [shape: f32[32,160], index: 2, kind: input, shape index: {}]   ;;  %s1547_s3 = inlined_call_operand.vmem [shape: f32[1,160], index: 3, kind: input, shape index: {}]   ;;  %s1548_s4 = inlined_call_operand.vmem [shape: f32[1,32], index: 4, kind: input, shape index: {}]   ;;  %s1549_s5 = inlined_call_operand.vmem [shape: f32[2,20,16], index: 5, kind: output, shape index: {0}]   ;;  %s1550_s6 = inlined_call_operand.vmem [shape: f32[2,20,2], index: 6, kind: output, shape index: {1}]   ;;  %s1551_s7 = inlined_call_operand.vmem [shape: f32[2,2,16], index: 7, kind: output, shape index: {2}]  }
   0x1   :  { %s1367_s26 = smov 0   ;;  %s1369_s27 = smov 0  }
   0x2   :  { %s1371_s28 = smov 0  }
   0x3 LB: > { %s27_s29 = sadd.s32 1, %s1302_s26  ;;  %s30_s30 = sadd.s32 1, %s1306_s27  ;;  %s1310_s28 = sphi %s1371_s28, %s18_s28   ;;  %s1306_s27 = sphi %s1369_s27, %s1557_s27   ;;  %s1302_s26 = sphi %s1367_s26, %s1556_s26   ;;  %s1298_s25 = sphi %s1365_s25, %s1555_s25   ;;  %s1294_s24 = sphi %s1363_s24, %s1554_s24  }
   0x4   : > { %p28_p0 = scmp.ge.s32.totalorder %s27_s29, 3  ;;  %p1096_p1 = scmp.ge.s32.totalorder %s1310_s28, 1 }
   0x5   : > { %p273_p2 = scmp.lt.s32.totalorder %s1310_s28, 7 }
   0x6   : > { %s1559_s29 = smov (%p28_p0, %s27_s29), 0  ;;  %s1561_s30 = smov (!%p28_p0, %s30_s30), %s1306_s27 }
   0x7   : > { %p274_p3 = pnand %p1096_p1, %p273_p2  ;;  %p32_p4 = scmp.ge.s32.totalorder %s1561_s30, 2 }
   0x8   : > { %p328_p5 = scmp.lt.s32.totalorder (!%p274_p3), %s1298_s25, 1  ;;  %p330_p6 = scmp.lt.s32.totalorder (!%p274_p3), %s1294_s24, 2 }
   0x9   : > { %s1563_s30 = smov (%p32_p4, %s1561_s30), 0  ;;  %277 = sbr.rel (%p274_p3) target bundleno = 1190 (0x4a6), region = 40 }
   0xa   : > { %1552 = sst [smem:[#allocation6_spill]] %s1563_s30  ;;  %p1103_p7 = scmp.ne.s32.totalorder (!%p274_p3), %s1294_s24, 0 }
  0x10   : > { %s1565_s25 = smov (!%p328_p5, %s1298_s25), 1  ;;  %vm378_vm0 = vcmask (!%p1103_p7), 261120   ;;  %v1312_v2 = vmov (!%p1103_p7), 0.0|0.0   ;;  %vm1313_vm2 = vmmov (!%p1103_p7), 0   ;;  %v1314_v4 = vmov (!%p1103_p7), 0.0   ;;  %v367_v5 = vld [vmem:[%s1546_s2] sm:$0xff] (!%p1103_p7) }
  0x11   : > { %s331_s8 = scalar_select %p330_p6, %s1294_s24, 2 }
  0x12   : > { %s1180_s9 = smul.u32 3, %s1565_s25  ;;  %s1118_s10 = sshll.u32 %s1565_s25, 4  ;;  %1164 = vmatprep.subr.bf16.mxu1 (!%p1103_p7), %v1312_v2  ;;  %vm1166_vm1 = vmpackc.low (!%p1103_p7), %vm378_vm0, %vm378_vm0  ;;  %1146 = vmatprep.mubr.msk.f32.mxu1 (!%p1103_p7), %vm1313_vm2, %v1314_v4  ;;  %vm573_vm3 = vcmask (!%p1103_p7), 122880   ;;  %v368_v6 = vld [vmem:[%s1546_s2 + $0x10] sm:$0xff] (!%p1103_p7)  ;;  %v369_v7 = vld [vmem:[%s1546_s2 + $0x20] sm:$0xff] (!%p1103_p7)  ;;  %v1315_v9 = vmov (!%p1103_p7), 32   ;;  %v469_v15 = vlaneseq (!%p1103_p7) }
  0x13   : > { %s340_s13 = scalar_lea.vmem %s1545_s1, %s1118_s10  ;;  %s1102_s14 = sshll.u32 %s1565_s25, 1  ;;  %594 = vst.msk [vmem:[#allocation5] sm:$0x1] (!%p1103_p7), %vm573_vm3, %v1314_v4  ;;  %v370_v8 = vld [vmem:[%s1546_s2 + $0x30] sm:$0xff] (!%p1103_p7)  ;;  %1232 = vset.pattern.permute.xlu0 (!%p1103_p7), %v1315_v9  ;;  %v1156_v10 = vpack.c.bf16 (!%p1103_p7), %v368_v6, %v367_v5  ;;  %v463_v12 = vld [vmem:[%s1547_s3] sm:$0x1] (!%p1103_p7) }
  0x14   : > { %s333_s15 = sadd.s32 %s1180_s9, %s331_s8  ;;  %s1403_s18 = scalar_lea.vmem %s1551_s7, %s1102_s14  ;;  %v365_v0 = vld [vmem:[%s340_s13] sm:$0xff] (!%p1103_p7)  ;;  %v366_v1 = vld [vmem:[%s340_s13 + $0x8] sm:$0xff] (!%p1103_p7)  ;;  %v1160_v11 = vpack.c.bf16 (!%p1103_p7), %v370_v8, %v369_v7  ;;  %466 = vperm.xlu0 (!%p1103_p7), %1232, %v463_v12   ;;  %vm592_vm4 = vcmask (!%p1103_p7), 0   ;;  %v1316_v14 = vmov (!%p1103_p7), -inf   ;;  %v470_v16 = vshrl.u32 (!%p1103_p7), %v469_v15, 7 }
  0x15   : > { %s1405_s19 = sshll.u32 %s333_s15, 3  ;;  %364 = sbr.rel (%p1103_p7) target bundleno = 281 (0x119), region = 44  ;;  %v1165_v3 = vpack.c.bf16 (!%p1103_p7), %v366_v1, %v365_v0  ;;  %1139 = vmatprep.mubr.msk.f32.mxu0 (!%p1103_p7), %vm378_vm0, %v365_v0  ;;  %1157 = vmatprep.subr.bf16.mxu0 (!%p1103_p7), %v1156_v10  ;;  %v462_v13 = vld [vmem:[%s1548_s4] sm:$0x1] (!%p1103_p7)  ;;  %593 = vst.msk [vmem:[#allocation4] sm:$0x1] (!%p1103_p7), %vm592_vm4, %v1316_v14 }
  0x16   : > { %s335_s22 = scalar_lea.vmem %s1544_s0, %s1405_s19  ;;  %s348_s10 = scalar_lea.vmem %s1549_s5, %s1405_s19  ;;  %1159 = vmatpush3.bf16.msra.mxu0 (!%p1103_p7), %v1156_v10  ;;  %v471_v17 = vsub.s32 (!%p1103_p7), 0, %v470_v16  ;;  %v1104_v23 = vld [vmem:[%s1547_s3] ss:$0 sm:$0xff] (!%p1103_p7) }
  0x17   : > { %s356_s9 = scalar_lea.vmem %s1550_s6, %s1405_s19  ;;  %1167 = vmatpush3.bf16.xpose.msk.msra.mxu1 (!%p1103_p7), %vm1166_vm1, %v1165_v3  ;;  %1161 = vmatprep.subr.bf16.mxu0 (!%p1103_p7), %v1160_v11 }
  0x1a   : > { %1163 = vmatpush3.bf16.msra.mxu0 (!%p1103_p7), %v1160_v11 }
  0x1d   : > { %1140 = vmatmul.mubr.msk.f32.vlgmr.msra.gmra.mrb[0].mxu0 %vm378_vm0, %v366_v1 }
  0x1e   : > { %1147 = vmatmul.mubr.msk.f32.vlgmr.msra.gmra.mrb[0].mxu1 %vm378_vm0, %v462_v13 }
  0x93   : > { %v467_v18 = vpop.permute.xlu0 %466 }
  0x94   : > { %v472_v19 = vrot.slane %v467_v18, %v471_v17 }
  0xf0   : > { %v1141_v26 = vpop.f32.mrb[0].mxu0 }
  0xf1   : > { %v542_v20 = vpop.f32.mrb[0].mxu1  ;;  %v457_v27 = vadd.f32 %v1141_v26, %v1104_v23  ;;  %v451_v28 = vpop.f32.mrb[1].mxu0 }
  0xf2   : > { %v543_v21 = vadd.f32 %v542_v20, %v472_v19  ;;  %v1148_v22 = vpop.f32.mrb[1].mxu1  ;;  %v452_v31 = vadd.f32 %v1104_v23, %v451_v28 }
  0xf3   : > { %461 = vst.msk [vmem:[#allocation2 + $0x8] sm:$0xff] %vm378_vm0, %v457_v27 }
  0xf4   : > { %v547_v24 = vsub.f32 0.0, %v543_v21  ;;  %v560_v25 = vmul.f32 1.442695, %v543_v21  ;;  %460 = vst.msk [vmem:[#allocation2] sm:$0xff] %vm378_vm0, %v452_v31  ;;  %vm546_vm8 = vcmp.ge.f32.partialorder %v543_v21, 0.0 }
  0xf6   : > { %v548_v29 = vmul.f32 1.442695, %v547_v24  ;;  %1233 = vpow2.f32 %v560_v25  ;;  %v576_v30 = vsub.f32 0.0, %v547_v24  ;;  %vm575_vm9 = vcmp.ge.f32.partialorder %v547_v24, 0.0 }
  0xf8   : > { %1235 = vpow2.f32 %v548_v29  ;;  %v577_v32 = vmul.f32 1.442695, %v576_v30 }
  0xfa   : > { %1237 = vpow2.f32 %v577_v32 }
 0x100   : > { %v1234_v33 = vpop.eup %1233 }
 0x101   : > { %v562_v34 = vadd.f32 1.0, %v1234_v33  ;;  %v565_v39 = vmul.f32 -0.5, %v1234_v33  ;;  %v568_v43 = vand.u32 2147483647, %v1234_v33 }
 0x102   : > { %v1236_v35 = vpop.eup %1235 }
 0x103   : > { %v550_v36 = vadd.f32 1.0, %v1236_v35  ;;  %1239 = vlog2.f32 %v562_v34  ;;  %v553_v40 = vmul.f32 -0.5, %v1236_v35  ;;  %v566_v41 = vadd.f32 1.0, %v565_v39 }
 0x104   : > { %v1238_v37 = vpop.eup %1237  ;;  %v556_v46 = vand.u32 2147483647, %v1236_v35  ;;  %vm569_vm5 = vcmp.lt.f32.partialorder %v568_v43, 0.0004427343 }
 0x105   : > { %1241 = vlog2.f32 %v550_v36  ;;  %v579_v38 = vadd.f32 1.0, %v1238_v37  ;;  %v582_v42 = vmul.f32 -0.5, %v1238_v37  ;;  %v554_v44 = vadd.f32 1.0, %v553_v40 }
 0x106   : > { %v567_v48 = vmul.f32 %v1234_v33, %v566_v41  ;;  %v585_v51 = vand.u32 2147483647, %v1238_v37  ;;  %vm557_vm6 = vcmp.lt.f32.partialorder %v556_v46, 0.0004427343 }
 0x107   : > { %1243 = vlog2.f32 %v579_v38  ;;  %v583_v49 = vadd.f32 1.0, %v582_v42  ;;  %v555_v53 = vmul.f32 %v1236_v35, %v554_v44 }
 0x108   : > { %vm586_vm7 = vcmp.lt.f32.partialorder %v585_v51, 0.0004427343 }
 0x109   : > { %v584_v58 = vmul.f32 %v1238_v37, %v583_v49 }
 0x10d   : > { %v1240_v45 = vpop.eup %1239 }
 0x10e   : > { %v564_v47 = vmul.f32 0.6931472, %v1240_v45 }
 0x10f   : > { %v1242_v50 = vpop.eup %1241 }
 0x110   : > { %v552_v52 = vmul.f32 0.6931472, %v1242_v50  ;;  %v570_v54 = vsel %vm569_vm5, %v567_v48, %v564_v47 }
 0x111   : > { %v1244_v55 = vpop.eup %1243  ;;  %v571_v60 = vsub.f32 %v543_v21, %v570_v54 }
 0x112   : > { %v558_v56 = vsel %vm557_vm6, %v555_v53, %v552_v52  ;;  %v581_v57 = vmul.f32 0.6931472, %v1244_v55 }
 0x113   : > { %v559_v59 = vsub.f32 0.0, %v558_v56  ;;  %v589_v0 = vsub.f32 %v547_v24, %v558_v56 }
 0x114   : > { %v587_v61 = vsel %vm586_vm7, %v584_v58, %v581_v57 }
 0x115   : > { %v572_v62 = vsel %vm546_vm8, %v559_v59, %v571_v60  ;;  %v588_v63 = vsub.f32 0.0, %v587_v61 }
 0x116   : > { %574 = vst.msk [vmem:[#allocation3] sm:$0x1] %vm573_vm3, %v572_v62 }
 0x117   : > { %v590_v1 = vsel %vm575_vm9, %v588_v63, %v589_v0 }
 0x118   : > { %591 = vst.msk [vmem:[%s1403_s18 + $0x1] sm:$0x1] %vm573_vm3, %v590_v1 }
 0x119 PF: > { %v597_v2 = vld [vmem:[%s1546_s2 + $0x8] sm:$0xff]  ;;  %v599_v3 = vld [vmem:[%s1546_s2 + $0x18] sm:$0xff]  ;;  %v596_v4 = vld [vmem:[%s1546_s2] sm:$0xff]  ;;  %v1317_v9 = vmov 0.0   ;;  %v1318_v10 = vmov 0.0|0.0   ;;  %vm611_vm10 = vcmask 261120   ;;  %v606_v20 = vlaneseq }
 0x11a   : > { %v1168_v5 = vpack.c.bf16 %v599_v3, %v597_v2  ;;  %v598_v6 = vld [vmem:[%s1546_s2 + $0x10] sm:$0xff]  ;;  %v601_v7 = vld [vmem:[%s1546_s2 + $0x28] sm:$0xff]  ;;  %v603_v8 = vld [vmem:[%s1546_s2 + $0x38] sm:$0xff]  ;;  %679 = vmatprep.mubr.f32.mxu0 %v1317_v9  ;;  %1176 = vmatprep.subr.bf16.mxu1 %v1318_v10  ;;  %vm1319_vm12 = vmmov 0   ;;  %vm766_vm0 = vcmask 130048   ;;  %v1320_v58 = vmov 0  }
 0x11b   : > { %v1170_v11 = vpack.c.bf16 %v598_v6, %v596_v4  ;;  %v1172_v12 = vpack.c.bf16 %v603_v8, %v601_v7  ;;  %v600_v13 = vld [vmem:[%s1546_s2 + $0x20] sm:$0xff]  ;;  %v602_v14 = vld [vmem:[%s1546_s2 + $0x30] sm:$0xff]  ;;  %v686_v16 = vld [vmem:[#allocation2 + $0x8] sm:$0xff]  ;;  %1153 = vmatprep.mubr.msk.f32.mxu1 %vm1319_vm12, %v1317_v9  ;;  %v607_v21 = vshrl.u32 %v606_v20, 7  ;;  %1245 = vset.pattern.permute.xlu1 %v1320_v58  ;;  %v1321_v59 = vmov 32   ;;  %p1115_p8 = scmp.ne.s32.totalorder %s1294_s24, 2 }
 0x11c   : > { %1169 = vmatprep.subr.bf16.mxu0 %v1168_v5  ;;  %v685_v15 = vld [vmem:[#allocation2] sm:$0xff]  ;;  %vm1178_vm11 = vmpackc.low %vm611_vm10, %vm611_vm10  ;;  %v1174_v17 = vpack.c.bf16 %v602_v14, %v600_v13  ;;  %1246 = vset.pattern.permute.xlu0 %v1321_v59  ;;  %v861_v5 = vld [vmem:[#allocation4] sm:$0x1]  ;;  %vm893_vm2 = vcmask 0   ;;  %vm891_vm5 = vcmask 122880   ;;  %vm853_vm7 = vcmask 15360  }
 0x11d   : > { %1171 = vmatpush1.bf16.msra.mxu0 %v1170_v11  ;;  %v1177_v18 = vpack.c.bf16 %v686_v16, %v685_v15  ;;  %v595_v19 = vld [vmem:[%s335_s22] sm:$0xff]  ;;  %v1485_v22 = vsub.s32 0, %v607_v21  ;;  %s1114_s22 = sshll.u32 %s1294_s24, 3 }
 0x11e   : > { %1173 = vmatprep.subr.bf16.mxu0 %v1172_v12  ;;  %v604_v23 = vld [vmem:[%s1547_s3] sm:$0x3]  ;;  %v771_v52 = vstv %s1114_s22 }
 0x11f   : > { %1179 = vmatpush3.bf16.xpose.msk.msra.mxu1 %vm1178_vm11, %v1177_v18  ;;  %v609_v24 = vrot.slane %v604_v23, %v1485_v22  ;;  %v772_v53 = vadd.s32 %v771_v52, %v607_v21 }
 0x121   : > { %1175 = vmatpush1.bf16.msra.mxu0 %v1174_v17  ;;  %vm773_vm1 = vcmp.lt.s32.totalorder %v772_v53, 20 }
 0x124   : > { %1110 = vmatmul.mubr.msk.f32.vlgmr.msra.gmra.mrb[0].mxu0 %vm611_vm10, %v595_v19 }
 0x1f7   : > { %v681_v25 = vpop.f32.mrb[0].mxu0 }
 0x1f8   : > { %v682_v26 = vadd.f32 %v681_v25, %v609_v24  ;;  %v683_v27 = vpop.f32.mrb[1].mxu0 }
 0x1fa   : > { %v809_v28 = vmul.f32 1.442695, %v682_v26  ;;  %1154 = vmatmul.mubr.msk.f32.vlgmr.msra.gmra.mrb[0].mxu1 %vm611_vm10, %v682_v26  ;;  %v1492_v29 = vsub.f32 0.0, %v682_v26  ;;  %vm795_vm15 = vcmp.ge.f32.partialorder %v682_v26, 0.0 }
 0x1fc   : > { %1249 = vpow2.f32 %v809_v28  ;;  %v797_v30 = vmul.f32 1.442695, %v1492_v29  ;;  %v824_v60 = vsub.f32 0.0, %v1492_v29  ;;  %vm823_vm4 = vcmp.ge.f32.partialorder %v1492_v29, 0.0 }
 0x1fe   : > { %1251 = vpow2.f32 %v797_v30  ;;  %v825_v61 = vmul.f32 1.442695, %v824_v60  ;;  %v913_v60 = vld [vmem:[#allocation3] sm:$0x1] (!%p1115_p8) }
 0x206   : > { %v1250_v31 = vpop.eup %1249 }
 0x207   : > { %v811_v32 = vadd.f32 1.0, %v1250_v31  ;;  %v814_v35 = vmul.f32 -0.5, %v1250_v31  ;;  %v817_v38 = vand.u32 2147483647, %v1250_v31 }
 0x208   : > { %v1252_v33 = vpop.eup %1251 }
 0x209   : > { %v799_v34 = vadd.f32 1.0, %v1252_v33  ;;  %1253 = vlog2.f32 %v811_v32  ;;  %v802_v36 = vmul.f32 -0.5, %v1252_v33  ;;  %v815_v37 = vadd.f32 1.0, %v814_v35 }
 0x20a   : > { %v805_v41 = vand.u32 2147483647, %v1252_v33  ;;  %vm818_vm13 = vcmp.lt.f32.partialorder %v817_v38, 0.0004427343 }
 0x20b   : > { %1255 = vlog2.f32 %v799_v34  ;;  %v803_v39 = vadd.f32 1.0, %v802_v36  ;;  %v816_v43 = vmul.f32 %v1250_v31, %v815_v37 }
 0x20c   : > { %vm806_vm14 = vcmp.lt.f32.partialorder %v805_v41, 0.0004427343  ;;  %1257 = vpow2.f32 %v825_v61 }
 0x20d   : > { %v804_v46 = vmul.f32 %v1252_v33, %v803_v39  ;;  %v863_v39 = vld [vmem:[#allocation5] sm:$0x1] }
 0x213   : > { %v1254_v40 = vpop.eup %1253 }
 0x214   : > { %v813_v42 = vmul.f32 0.6931472, %v1254_v40 }
 0x215   : > { %v1256_v44 = vpop.eup %1255 }
 0x216   : > { %v801_v45 = vmul.f32 0.6931472, %v1256_v44  ;;  %v819_v47 = vsel %vm818_vm13, %v816_v43, %v813_v42  ;;  %v1258_v3 = vpop.eup %1257 }
 0x217   : > { %v820_v50 = vsub.f32 %v682_v26, %v819_v47  ;;  %v827_v7 = vadd.f32 1.0, %v1258_v3  ;;  %v830_v15 = vmul.f32 -0.5, %v1258_v3  ;;  %v833_v19 = vand.u32 2147483647, %v1258_v3 }
 0x218   : > { %v1495_v48 = vsel %vm806_vm14, %v804_v46, %v801_v45 }
 0x219   : > { %v808_v49 = vsub.f32 0.0, %v1495_v48  ;;  %1259 = vlog2.f32 %v827_v7  ;;  %v831_v17 = vadd.f32 1.0, %v830_v15  ;;  %vm834_vm3 = vcmp.lt.f32.partialorder %v833_v19, 0.0004427343 }
 0x21a   : > { %v837_v30 = vsub.f32 %v1492_v29, %v1495_v48 }
 0x21b   : > { %v1498_v51 = vsel %vm795_vm15, %v808_v49, %v820_v50  ;;  %v832_v25 = vmul.f32 %v1258_v3, %v831_v17  ;;  %v840_v50 = vand.u32 127, %v606_v20 }
 0x21d   : > { %vm841_vm6 = vcmp.eq.s32.totalorder %v840_v50, 0 }
 0x223   : > { %v1260_v16 = vpop.eup %1259 }
 0x224   : > { %v829_v23 = vmul.f32 0.6931472, %v1260_v16 }
 0x226   : > { %v835_v26 = vsel %vm834_vm3, %v832_v25, %v829_v23 }
 0x227   : > { %v836_v28 = vsub.f32 0.0, %v835_v26 }
 0x229   : > { %v838_v31 = vsel %vm823_vm4, %v836_v28, %v837_v30 }
 0x2cd   : > { %v762_v54 = vpop.f32.mrb[0].mxu1 }
 0x2ce   : > { %767 = vst.msk [vmem:[%s348_s10] sm:$0xff] %vm766_vm0, %v762_v54  ;;  %v1155_v55 = vpop.f32.mrb[1].mxu1  ;;  %v776_v56 = vsel %vm773_vm1, %v762_v54, -inf }
 0x2cf   : > { %v777_v57 = vsel %vm766_vm0, %v776_v56, -inf }
 0x2d0   : > { %778 = vmax.xlane.f32.xlu0 %v777_v57 }
 0x35d   : > { %v779_v62 = vpop.xlane.xlu0 %778 }
 0x35e   : > { %v780_v63 = vrot.slane %v779_v62, 4 }
 0x360   : > { %v781_v0 = vmax.f32 %v779_v62, %v780_v63 }
 0x362   : > { %v782_v1 = vrot.slane %v781_v0, 2 }
 0x364   : > { %v783_v2 = vmax.f32 %v781_v0, %v782_v1 }
 0x366   : > { %v784_v4 = vrot.slane %v783_v2, 1 }
 0x368   : > { %v785_v6 = vmax.f32 %v783_v2, %v784_v4 }
 0x36a   : > { %v862_v8 = vmax.f32 %v861_v5, %v785_v6  ;;  %v786_v9 = vsub.f32 %v776_v56, %v785_v6 }
 0x36c   : > { %894 = vst.msk [vmem:[#allocation4] sm:$0x1] %vm893_vm2, %v862_v8  ;;  %v787_v10 = vmul.f32 1.442695, %v786_v9  ;;  %v864_v11 = vsub.f32 %v861_v5, %v862_v8  ;;  %v877_v12 = vsub.f32 %v785_v6, %v862_v8 }
 0x36e   : > { %1261 = vpow2.f32 %v787_v10  ;;  %v865_v13 = vmul.f32 1.442695, %v864_v11  ;;  %v878_v14 = vmul.f32 1.442695, %v877_v12 }
 0x370   : > { %1263 = vpow2.f32 %v865_v13 }
 0x371   : > { %1265 = vpow2.f32 %v878_v14 }
 0x373   : > { %v899_v55 = vld [vmem:[#allocation4] sm:$0x1] (!%p1115_p8) }
 0x378   : > { %v1262_v18 = vpop.eup %1261 }
 0x379   : > { %v789_v21 = vsel %vm766_vm0, %v1262_v18, 0.0 }
 0x37a   : > { %790 = vadd.xlane.f32.xlu0 %v789_v21  ;;  %v1264_v24 = vpop.eup %1263  ;;  %v855_v32 = vrot.slane %v789_v21, 4 }
 0x37b   : > { %869 = vperm.xlu1 %1245, %v1264_v24   ;;  %v1266_v27 = vpop.eup %1265 }
 0x37c   : > { %v856_v33 = vadd.f32 %v855_v32, %v789_v21 }
 0x37e   : > { %v857_v34 = vrot.slane %v856_v33, 2 }
 0x37f   : > { %882 = vperm.xlu1 %1245, %v1266_v27  }
 0x380   : > { %v858_v35 = vadd.f32 %v857_v34, %v856_v33 }
 0x382   : > { %v859_v37 = vrot.slane %v858_v35, 1 }
 0x383   : > { %1247 = vset.pattern.permute.xlu1 %v1321_v59 }
 0x384   : > { %849 = vperm.xlu1 %1247, %v838_v31   ;;  %v860_v41 = vadd.f32 %v859_v37, %v858_v35 }
 0x3fa   : > { %v870_v36 = vpop.permute.xlu1 %869 }
 0x3fb   : > { %v875_v38 = vrot.slane %v870_v36, %v1485_v22 }
 0x3fd   : > { %v876_v43 = vmul.f32 %v875_v38, %v863_v39 }
 0x3fe   : > { %v883_v40 = vpop.permute.xlu1 %882 }
 0x3ff   : > { %v888_v42 = vrot.slane %v883_v40, %v1485_v22 }
 0x401   : > { %v889_v44 = vmul.f32 %v888_v42, %v860_v41 }
 0x403   : > { %v890_v29 = vadd.f32 %v889_v44, %v876_v43  ;;  %v850_v52 = vpop.permute.xlu1 %849 }
 0x405   : > { %892 = vst.msk [vmem:[#allocation5] sm:$0x1] %vm891_vm5, %v890_v29 }
 0x407   : > { %v791_v45 = vpop.xlane.xlu0 %790 }
 0x408   : > { %1267 = vlog2.f32 %v791_v45 }
 0x40c   : > { %v900_v56 = vld [vmem:[#allocation5] sm:$0x1] (!%p1115_p8) }
 0x40d   : > { %1270 = vlog2.f32 (!%p1115_p8), %v900_v56 }
 0x412   : > { %v1268_v46 = vpop.eup %1267 }
 0x413   : > { %v793_v47 = vmul.f32 0.6931472, %v1268_v46 }
 0x415   : > { %v794_v48 = vadd.f32 %v793_v47, %v785_v6 }
 0x417   : > { %v822_v49 = vsub.f32 %v794_v48, %v1498_v51  ;;  %v1322_v51 = vmov (!%p1115_p8), 0   ;;  %v1271_v20 = vpop.eup (!%p1115_p8), %1270 }
 0x418   : > { %v902_v57 = vmul.f32 (!%p1115_p8), 0.6931472, %v1271_v20 }
 0x419   : > { %844 = vperm.xlu0 %1246, %v822_v49  }
 0x41d   : > { %1248 = vset.pattern.permute.xlu0 %v1320_v58 }
 0x41e   : > { %1269 = vset.pattern.permute.xlu0 (!%p1115_p8), %v1322_v51 }
 0x41f   : > { %905 = vperm.xlu0 (!%p1115_p8), %1269, %v899_v55  }
 0x494   : > { %898 = sbr.rel (%p1115_p8) target bundleno = 1190 (0x4a6), region = 48 }
 0x498   : > { %v845_v53 = vpop.permute.xlu0 %844 }
 0x499   : > { %v852_v54 = vsel %vm841_vm6, %v845_v53, %v850_v52 }
 0x49a   : > { %854 = vst.msk [vmem:[%s356_s9] sm:$0xff] %vm853_vm7, %v852_v54 }
 0x49e   : > { %v906_v58 = vpop.permute.xlu0 %905 }
 0x49f   : > { %v911_v59 = vrot.slane %v906_v58, %v1485_v22 }
 0x4a1   : > { %v912_v61 = vadd.f32 %v911_v59, %v902_v57 }
 0x4a3   : > { %v914_v62 = vsub.f32 %v912_v61, %v913_v60 }
 0x4a5   : > { %915 = vst.msk [vmem:[%s1403_s18] sm:$0x1] %vm891_vm5, %v914_v62 }
 0x4a6 PF: > { %s18_s28 = sadd.s32 1, %s1310_s28   ;;  %s1553_s19 = sld [smem:[#allocation6_spill]] }
 0x4a7   : > { %p15_p9 = scmp.ge.s32.totalorder %s18_s28, 8   ;;  %s1554_s24 = smov %s1302_s26 }
 0x4a8   : > { %s1555_s25 = smov %s1306_s27  ;;  %s1556_s26 = smov %s1559_s29 }
 0x4a9   :  { %17 = sbr.rel (!%p15_p9) target bundleno = 3 (0x3), region = 105 }
 0x4ac   : > { %s1557_s27 = smov %s1553_s19 }

</bundles_post_ra>
